<compile_context>
chip_gen: v7x
topology: tpu7x:2x2x1
jax: 0.10.0
libtpu: 0.0.40
codegen_flags: <defaults>
</compile_context>

<pallas_src>
import math
from functools import lru_cache

import jax
import jax.numpy as jnp
from jax.experimental import pallas as pl
from jax.experimental.pallas import tpu as pltpu


def _round_up(x, m):
    return ((x + m - 1) // m) * m


def _tpu_vmem_capacity_bytes():
    """Generation-aware VMEM capacity (128 MiB v5e/v6e, 64 MiB v7x per core)."""
    try:
        cap = int(pltpu.get_tpu_info().vmem_capacity_bytes)
        if cap >= 16 * 1024 * 1024:
            return cap
    except Exception:
        pass
    return 64 * 1024 * 1024  # conservative fallback (v7x per-core VMEM)


_VMEM_CAP = _tpu_vmem_capacity_bytes()
_VMEM_LIMIT = min((_VMEM_CAP * 3) // 4, 96 * 1024 * 1024)
_TILE_BUDGET = min((_VMEM_CAP * 2) // 5, 48 * 1024 * 1024)


def _level_layout(spatial_shapes):
    """Per level: (H, W, S=H*W, S_pad=round_up(S,128), padded start offset)."""
    meta, start = [], 0
    for (H, W) in spatial_shapes:
        S = H * W
        Sp = _round_up(S, 128)
        meta.append((H, W, S, Sp, start))
        start += Sp
    return tuple(meta), start


# ---------------------------------------------------------------------------
# Pallas kernel 1: fused linear  y = x @ Wt + b   (M-tiled, pipelined)
# ---------------------------------------------------------------------------
def _linear_kernel(x_ref, w_ref, b_ref, o_ref):
    o_ref[...] = (
        jnp.dot(x_ref[...], w_ref[...], preferred_element_type=jnp.float32)
        + b_ref[...]
    ).astype(o_ref.dtype)


def pallas_linear(x2d, w_kt, b, m_tile=1024, out_dtype=jnp.float32):
    """x2d: (M, K), w_kt: (K, O), b: (O,) -> (M, O) in out_dtype."""
    M, K = x2d.shape
    K2, O = w_kt.shape
    assert K == K2
    mt = min(m_tile, _round_up(M, 8))
    Mp = _round_up(M, mt)
    if Mp != M:
        x2d = jnp.pad(x2d, ((0, Mp - M), (0, 0)))
    out_bytes = jnp.dtype(out_dtype).itemsize
    out = pl.pallas_call(
        _linear_kernel,
        out_shape=jax.ShapeDtypeStruct((Mp, O), out_dtype),
        grid=(Mp // mt,),
        in_specs=[
            pl.BlockSpec((mt, K), lambda i: (i, 0)),
            pl.BlockSpec((K, O), lambda i: (0, 0)),
            pl.BlockSpec((1, O), lambda i: (0, 0)),
        ],
        out_specs=pl.BlockSpec((mt, O), lambda i: (i, 0)),
        compiler_params=pltpu.CompilerParams(
            dimension_semantics=("parallel",),
            vmem_limit_bytes=_VMEM_LIMIT),
        cost_estimate=pl.CostEstimate(
            flops=2 * Mp * K * O,
            transcendentals=0,
            bytes_accessed=4 * (Mp * K + K * O + O) + out_bytes * Mp * O),
    )(x2d, w_kt, b.reshape(1, O))
    return out[:M] if Mp != M else out


# ---------------------------------------------------------------------------
# Pallas kernel 2: multi-scale deformable attention core
# ---------------------------------------------------------------------------
def _make_core_kernel(level_meta, n_heads, n_levels, n_points, d_head, n_wbuf):
    Hh, L, P = n_heads, n_levels, n_points

    def kernel(val_ref, lx_ref, ly_ref, aw_ref, o_ref, w_scratch):
        Tq = lx_ref.shape[1]

        # Hoist the per-grid-step sampling blocks once (lane-dense loads); all
        # later (h, l, p) accesses slice the in-register values.
        lx = lx_ref[0]          # (Tq, H*L*P)  normalized x
        ly = ly_ref[0]          # (Tq, H*L*P)  normalized y
        aw = aw_ref[0]          # (Tq, H*L*P)  attention weights

        # Per-level row / col pixel-coordinate vectors, (1, H) and (1, W):
        # exact integer iotas, hoisted out of the head / point loops.
        coords = []
        for (H, W, S, Sp, start) in level_meta:
            colf = jax.lax.broadcasted_iota(jnp.int32, (1, W), 1).astype(jnp.float32)
            rowf = jax.lax.broadcasted_iota(jnp.int32, (1, H), 1).astype(jnp.float32)
            coords.append((rowf, colf))

        outs = []
        for h in range(Hh):
            buf = h % n_wbuf   # ping-pong so head h+1's build overlaps head h's matmul
            # Build this head's (Tq, Len_in_pad) combined weight matrix in VMEM
            # scratch with the separable bilinear-hat form.
            for l, (H, W, S, Sp, start) in enumerate(level_meta):
                rowf, colf = coords[l]
                c0 = (h * L + l) * P
                # grid_sample(align_corners=False): pixel = loc * size - 0.5
                x = lx[:, c0:c0 + P] * float(W) - 0.5      # (Tq, P)
                y = ly[:, c0:c0 + P] * float(H) - 0.5
                a = aw[:, c0:c0 + P]

                hx_a, hy = [], []
                for p in range(P):
                    xp = x[:, p:p + 1]                     # (Tq, 1)
                    yp = y[:, p:p + 1]
                    ap = a[:, p:p + 1]
                    # Hat factors at small width; out-of-range samples decay to
                    # 0, reproducing grid_sample zero padding for free.  The
                    # attention weight is folded into the column factor here.
                    hx_a.append(ap * jnp.maximum(1.0 - jnp.abs(colf - xp), 0.0))  # (Tq, W)
                    hy.append(jnp.maximum(1.0 - jnp.abs(rowf - yp), 0.0))          # (Tq, H)

                # Expand to (Tq, S) row-block by row-block: per point only a
                # single multiply-accumulate at width W (vs ~11 full-width VPU
                # ops/point in the non-separable form).
                # TODO(synk): for very large H, switch to a tile/shape-cast based
                #             expansion once Mosaic support is confirmed (IR size).
                row_blocks = []
                for r in range(H):
                    blk = hy[0][:, r:r + 1] * hx_a[0]
                    for p in range(1, P):
                        blk = blk + hy[p][:, r:r + 1] * hx_a[p]
                    row_blocks.append(blk)                 # (Tq, W)
                if Sp > S:
                    row_blocks.append(jnp.zeros((Tq, Sp - S), jnp.float32))
                w_flat = jnp.concatenate(row_blocks, axis=1)          # (Tq, Sp)
                # start and Sp are multiples of 128 -> lane-aligned scratch write.
                w_scratch[buf, :, start:start + Sp] = w_flat.astype(w_scratch.dtype)

            # One fused MXU matmul over all (padded) levels, f32 accumulation.
            v_h = val_ref[0, :, h * d_head:(h + 1) * d_head]          # (Len_in_pad, d_head)
            outs.append(jnp.dot(w_scratch[buf], v_h,
                                preferred_element_type=jnp.float32))

        # Single lane-dense (Tq, d_model) output store per grid step.
        o_ref[0] = jnp.concatenate(outs, axis=1).astype(o_ref.dtype)

    return kernel


@lru_cache(maxsize=None)
def _build_core_call(spatial_shapes, N, Len_q_pad, d_model,
                     n_heads, n_levels, n_points, q_tile,
                     val_dtype_name, mxu_dtype_name, n_wbuf):
    level_meta, Len_in_pad = _level_layout(spatial_shapes)
    d_head = d_model // n_heads
    HLP = n_heads * n_levels * n_points
    mxu_dtype = jnp.dtype(mxu_dtype_name)
    val_bytes = jnp.dtype(val_dtype_name).itemsize
    kernel = _make_core_kernel(level_meta, n_heads, n_levels, n_points, d_head, n_wbuf)

    n_qt = Len_q_pad // q_tile
    flops = (2 * N * n_heads * Len_q_pad * Len_in_pad * d_head
             + 4 * N * n_heads * n_points * Len_q_pad * Len_in_pad)
    bytes_accessed = (val_bytes * N * Len_in_pad * d_model
                      + 4 * 3 * N * Len_q_pad * HLP
                      + 4 * N * Len_q_pad * d_model)

    return pl.pallas_call(
        kernel,
        out_shape=jax.ShapeDtypeStruct((N, Len_q_pad, d_model), jnp.float32),
        grid=(N, n_qt),
        in_specs=[
            # Resident value block: constant over the q axis, re-fetched only per
            # batch row.  TODO(synk): pipeline_mode=pl.Buffered(1) on v7x to
            # single-buffer it once buffer_count=1 support is confirmed.
            pl.BlockSpec((1, Len_in_pad, d_model), lambda n, q: (n, 0, 0)),
            pl.BlockSpec((1, q_tile, HLP), lambda n, q: (n, q, 0)),
            pl.BlockSpec((1, q_tile, HLP), lambda n, q: (n, q, 0)),
            pl.BlockSpec((1, q_tile, HLP), lambda n, q: (n, q, 0)),
        ],
        out_specs=pl.BlockSpec((1, q_tile, d_model), lambda n, q: (n, q, 0)),
        scratch_shapes=[pltpu.VMEM((n_wbuf, q_tile, Len_in_pad), mxu_dtype)],
        compiler_params=pltpu.CompilerParams(
            # TODO(synk): pltpu.CORE_PARALLEL on axis 0 for v7x dual-TC split.
            dimension_semantics=("parallel", "parallel"),
            vmem_limit_bytes=_VMEM_LIMIT),
        cost_estimate=pl.CostEstimate(flops=flops, transcendentals=0,
                                      bytes_accessed=int(bytes_accessed)),
    )


def _static_spatial_shapes(input_spatial_shapes):
    # TODO(synk): scalar-prefetch version keeping shapes on-device in SMEM; for now
    # shapes are static model config and the specialized kernel is cached per set.
    if isinstance(input_spatial_shapes, (list, tuple)):
        return tuple((int(h), int(w)) for h, w in input_spatial_shapes)
    arr = jax.device_get(input_spatial_shapes)
    return tuple((int(h), int(w)) for h, w in arr)


# ---------------------------------------------------------------------------
# Module wrapper (parameter init mirrors MSDeformAttn._reset_parameters)
# ---------------------------------------------------------------------------
class MSDeformAttnPallas:
    def __init__(self, d_model=32, n_levels=2, n_heads=4, n_points=4,
                 key=None, mxu_dtype=jnp.bfloat16):
        if d_model % n_heads != 0:
            raise ValueError("d_model must be divisible by n_heads")
        self.d_model = d_model
        self.n_levels = n_levels
        self.n_heads = n_heads
        self.n_points = n_points
        self.d_head = d_model // n_heads
        # bf16 MXU inputs (f32 accumulation); pass mxu_dtype=jnp.float32 for an
        # exact-precision validation path.
        self.mxu_dtype_name = jnp.dtype(mxu_dtype).name
        self.val_dtype = jnp.dtype(mxu_dtype)
        self.val_dtype_name = self.val_dtype.name
        self._n_wbuf = 2 if n_heads > 1 else 1

        if key is None:
            key = jax.random.PRNGKey(0)
        kv, ko = jax.random.split(key, 2)

        # Fused query projection: [sampling_offsets | attention_weights]
        off_dim = n_heads * n_levels * n_points * 2
        aw_dim = n_heads * n_levels * n_points
        self.off_dim = off_dim
        # sampling_offsets: weight = 0, bias = directional grid init
        thetas = jnp.arange(n_heads, dtype=jnp.float32) * (2.0 * math.pi / n_heads)
        grid_init = jnp.stack([jnp.cos(thetas), jnp.sin(thetas)], -1)        # (H, 2)
        grid_init = grid_init / jnp.abs(grid_init).max(-1, keepdims=True)
        grid_init = jnp.tile(grid_init.reshape(n_heads, 1, 1, 2),
                             (1, n_levels, n_points, 1))
        scale = jnp.arange(1, n_points + 1, dtype=jnp.float32).reshape(1, 1, n_points, 1)
        bso = (grid_init * scale).reshape(-1)                                # (off_dim,)
        # attention_weights: weight = 0, bias = 0
        self.Wqp_t = jnp.zeros((d_model, off_dim + aw_dim), jnp.float32)
        self.bqp = jnp.concatenate([bso, jnp.zeros((aw_dim,), jnp.float32)])

        # value_proj / output_proj: xavier uniform weight, zero bias
        bound = math.sqrt(6.0 / (d_model + d_model))
        self.Wv_t = jax.random.uniform(kv, (d_model, d_model), jnp.float32,
                                       -bound, bound)
        self.bv = jnp.zeros((d_model,), jnp.float32)
        self.Wo_t = jax.random.uniform(ko, (d_model, d_model), jnp.float32,
                                       -bound, bound)
        self.bo = jnp.zeros((d_model,), jnp.float32)

    def _pick_q_tile(self, Len_q, Len_in_pad, max_sp):
        HLP = self.n_heads * self.n_levels * self.n_points
        vb = self.val_dtype.itemsize
        wb = jnp.dtype(self.mxu_dtype_name).itemsize

        def est(t):
            return (2 * vb * Len_in_pad * self.d_model     # value block (double buffered)
                    + self._n_wbuf * wb * t * Len_in_pad    # ping-pong weight scratch
                    + 2 * 4 * 3 * t * HLP                   # lx / ly / aw blocks
                    + 2 * 4 * t * self.d_model              # output block
                    + 3 * 4 * t * max_sp)                   # in-flight f32 build temps

        tile = 16
        for cand in (512, 256, 128, 64, 32, 16):
            if est(cand) <= _TILE_BUDGET:
                tile = cand
                break
        # q_tile >= 16 (bf16 sublane tile of the scratch); pad Len_q up rather
        # than shrinking the tile below that.
        return max(16, min(tile, _round_up(Len_q, 16)))

    def __call__(self, query, reference_points, input_flatten,
                 input_spatial_shapes, input_level_start_index,
                 input_padding_mask=None):
        N, Len_q, _ = query.shape
        Nv, Len_in, _ = input_flatten.shape
        assert N == Nv
        d_model, Hh, L, P = self.d_model, self.n_heads, self.n_levels, self.n_points

        spatial_shapes = _static_spatial_shapes(input_spatial_shapes)
        assert len(spatial_shapes) == L
        assert sum(h * w for h, w in spatial_shapes) == Len_in
        level_meta, Len_in_pad = _level_layout(spatial_shapes)
        max_sp = max(sp for (_, _, _, sp, _) in level_meta)

        # --- value projection straight to the MXU dtype (halves HBM + VMEM) ---
        value = pallas_linear(input_flatten.reshape(N * Len_in, d_model),
                              self.Wv_t, self.bv,
                              out_dtype=self.val_dtype).reshape(N, Len_in, d_model)
        if input_padding_mask is not None:
            # TODO(synk): fold the padding mask into the value-projection kernel.
            value = jnp.where(input_padding_mask[..., None],
                              jnp.zeros((), value.dtype), value)

        # Pad every level to a multiple of 128 rows (padded columns get exactly
        # zero weight in the kernel, so the matmul result is unchanged).
        parts, off = [], 0
        for (H, W, S, Sp, start) in level_meta:
            parts.append(value[:, off:off + S])
            if Sp > S:
                parts.append(jnp.zeros((N, Sp - S, d_model), value.dtype))
            off += S
        value_p = jnp.concatenate(parts, axis=1)                      # (N, Len_in_pad, C)

        # --- fused sampling-offset + attention-weight projection (one matmul) ---
        q2 = query.reshape(N * Len_q, d_model)
        qp = pallas_linear(q2, self.Wqp_t, self.bqp)                  # (N*Len_q, off+aw)
        samp_off = qp[:, :self.off_dim].reshape(N, Len_q, Hh, L, P, 2)
        attn = qp[:, self.off_dim:].reshape(N, Len_q, Hh, L * P)
        attn = jax.nn.softmax(attn, axis=-1)                          # (N, Len_q, H, L*P)

        # --- sampling locations (small elementwise glue) ---
        ss = jnp.asarray(spatial_shapes, dtype=jnp.float32)           # (L, 2) = [H, W]
        if reference_points.shape[-1] == 2:
            offset_normalizer = jnp.stack([ss[:, 1], ss[:, 0]], -1)   # (L, 2)
            sampling_locations = (
                reference_points[:, :, None, :, None, :]
                + samp_off / offset_normalizer[None, None, None, :, None, :])
        elif reference_points.shape[-1] == 4:
            sampling_locations = (
                reference_points[:, :, None, :, None, :2]
                + samp_off / P * reference_points[:, :, None, :, None, 2:] * 0.5)
        else:
            raise ValueError("Last dim of reference_points must be 2 or 4")

        # Natural (N, Len_q, H, L, P) order flattened — no transposes needed.
        lx = sampling_locations[..., 0].reshape(N, Len_q, Hh * L * P)
        ly = sampling_locations[..., 1].reshape(N, Len_q, Hh * L * P)
        awk = attn.reshape(N, Len_q, Hh * L * P)

        # --- pad Len_q to the query tile and run the core kernel ---
        q_tile = self._pick_q_tile(Len_q, Len_in_pad, max_sp)
        Len_q_pad = _round_up(Len_q, q_tile)
        if Len_q_pad != Len_q:
            pad = ((0, 0), (0, Len_q_pad - Len_q), (0, 0))
            lx, ly, awk = jnp.pad(lx, pad), jnp.pad(ly, pad), jnp.pad(awk, pad)

        core_call = _build_core_call(spatial_shapes, N, Len_q_pad, d_model,
                                     Hh, L, P, q_tile,
                                     self.val_dtype_name, self.mxu_dtype_name,
                                     self._n_wbuf)
        core = core_call(value_p, lx, ly, awk)                        # (N, Lq_pad, C)
        if Len_q_pad != Len_q:
            core = core[:, :Len_q, :]

        # --- output projection (tiled Pallas matmul) ---
        out = pallas_linear(core.reshape(N * Len_q, d_model), self.Wo_t, self.bo)
        return out.reshape(N, Len_q, d_model)


# ---------------------------------------------------------------------------
if __name__ == "__main__":
    d_model, n_levels, n_heads, n_points = 32, 2, 4, 4
    N, Len_q = 2, 8
    spatial_shapes = ((8, 8), (4, 4))
    Len_in = sum(h * w for h, w in spatial_shapes)

    key = jax.random.PRNGKey(0)
    kp, kq, kf, kr = jax.random.split(key, 4)

    module = MSDeformAttnPallas(d_model, n_levels, n_heads, n_points, key=kp)

    query = jax.random.normal(kq, (N, Len_q, d_model), jnp.float32)
    input_flatten = jax.random.normal(kf, (N, Len_in, d_model), jnp.float32)
    reference_points = jax.random.uniform(kr, (N, Len_q, n_levels, 2), jnp.float32)
    input_spatial_shapes = jnp.array(spatial_shapes, jnp.int32)
    input_level_start_index = jnp.array(
        [0, spatial_shapes[0][0] * spatial_shapes[0][1]], jnp.int32)

    out = module(query, reference_points, input_flatten,
                 input_spatial_shapes, input_level_start_index)
    jax.block_until_ready(out)
    assert out.shape == (N, Len_q, d_model)
    assert bool(jnp.all(jnp.isfinite(out)))
    print("KERNEL_OK")
</pallas_src>

<mosaic_0001>
module attributes {stable_mosaic.version = 11 : i64} {
  func.func @_linear_kernel(%arg0: i32, %arg1: memref<160x32xf32, #tpu.memory_space<vmem>>, %arg2: memref<32x32xf32, #tpu.memory_space<vmem>>, %arg3: memref<1x32xf32, #tpu.memory_space<vmem>>, %arg4: memref<160x32xbf16, #tpu.memory_space<vmem>>) attributes {dimension_semantics = [#tpu.dimension_semantics<parallel>], iteration_bounds = array<i64: 1>, scalar_prefetch = 0 : i64, scratch_operands = 0 : i64, tpu.core_type = #tpu.core_type<tc>, window_params = [{transform_indices = @transform_0, window_bounds = array<i64: 160, 32>}, {pipeline_mode = #tpu.pipeline_mode<synchronous>, transform_indices = @transform_1, window_bounds = array<i64: 32, 32>}, {pipeline_mode = #tpu.pipeline_mode<synchronous>, transform_indices = @transform_2, window_bounds = array<i64: 1, 32>}, {transform_indices = @transform_3, window_bounds = array<i64: 160, 32>}]} {
    %c0 = arith.constant 0 : index
    %c0_0 = arith.constant 0 : index
    %0 = vector.load %arg1[%c0, %c0_0] : memref<160x32xf32, #tpu.memory_space<vmem>>, vector<160x32xf32>
    %c0_1 = arith.constant 0 : index
    %c0_2 = arith.constant 0 : index
    %1 = vector.load %arg2[%c0_1, %c0_2] : memref<32x32xf32, #tpu.memory_space<vmem>>, vector<32x32xf32>
    %cst = arith.constant dense<0.000000e+00> : vector<160x32xf32>
    %2 = tpu.matmul %0, %1, %cst {dimension_numbers = #tpu.dot_dimension_numbers<[1], [0], [0], [1], [0, 0, 1, 1], [], []>} : vector<160x32xf32>, vector<32x32xf32>, vector<160x32xf32> -> vector<160x32xf32>
    %c0_3 = arith.constant 0 : index
    %c0_4 = arith.constant 0 : index
    %3 = vector.load %arg3[%c0_3, %c0_4] : memref<1x32xf32, #tpu.memory_space<vmem>>, vector<1x32xf32>
    %4 = vector.broadcast %3 : vector<1x32xf32> to vector<160x32xf32>
    %5 = arith.addf %2, %4 : vector<160x32xf32>
    %6 = arith.truncf %5 : vector<160x32xf32> to vector<160x32xbf16>
    %c0_5 = arith.constant 0 : index
    %c0_6 = arith.constant 0 : index
    %7 = vector.load %arg4[%c0_5, %c0_6] : memref<160x32xbf16, #tpu.memory_space<vmem>>, vector<160x32xbf16>
    tpu.vector_store %arg4[%c0_5, %c0_6], %6 {strides = array<i32>} : memref<160x32xbf16, #tpu.memory_space<vmem>>, vector<160x32xbf16>,
    return
  }
  func.func @transform_0(%arg0: i32) -> (i32, i32) {
    %c0_i32 = arith.constant 0 : i32
    %c0_i32_0 = arith.constant 0 : i32
    return %arg0, %c0_i32 : i32, i32
  }
  func.func @transform_1(%arg0: i32) -> (i32, i32) {
    %c0_i32 = arith.constant 0 : i32
    %c0_i32_0 = arith.constant 0 : i32
    %c0_i32_1 = arith.constant 0 : i32
    return %c0_i32, %c0_i32_0 : i32, i32
  }
  func.func @transform_2(%arg0: i32) -> (i32, i32) {
    %c0_i32 = arith.constant 0 : i32
    %c0_i32_0 = arith.constant 0 : i32
    %c0_i32_1 = arith.constant 0 : i32
    return %c0_i32, %c0_i32_0 : i32, i32
  }
  func.func @transform_3(%arg0: i32) -> (i32, i32) {
    %c0_i32 = arith.constant 0 : i32
    %c0_i32_0 = arith.constant 0 : i32
    return %arg0, %c0_i32 : i32, i32
  }
}

</mosaic_0001>

<bundles_post_ra>
// kernel: tpu_custom_call.1
= control target key start
LH: loop header
LB: loop body
LE: loop exit
PB: predicated region body
PF: predicated region fallthrough
CT: control target
= control target key end

     0   :  { %vm45_vm0 = vcmask 261120   ;;  %vm351_vm1 = vcmask 257024   ;;  %s728_s1 = inlined_call_operand.vmem [shape: f32[32,32], index: 1, kind: input, shape index: {}]   ;;  %s729_s0 = inlined_call_operand.vmem [shape: f32[160,32], index: 0, kind: input, shape index: {}]   ;;  %s730_s2 = inlined_call_operand.vmem [shape: f32[1,32], index: 2, kind: input, shape index: {}]   ;;  %s731_s3 = inlined_call_operand.vmem [shape: bf16[160,32], index: 3, kind: output, shape index: {}]  }
   0x1   :  { %v34_v0 = vld [vmem:[%s728_s1] sm:$0xff]  ;;  %v35_v1 = vld [vmem:[%s728_s1 + $0x8] sm:$0xff]  ;;  %v36_v2 = vld [vmem:[%s728_s1 + $0x10] sm:$0xff] }
   0x2   :  { %v499_v3 = vpack.c.bf16 %v35_v1, %v34_v0  ;;  %v37_v4 = vld [vmem:[%s728_s1 + $0x18] sm:$0xff]  ;;  %v14_v5 = vld [vmem:[%s729_s0] sm:$0xff]  ;;  %v24_v6 = vld [vmem:[%s729_s0 + $0x50] sm:$0xff] }
   0x3   :  { %v503_v7 = vpack.c.bf16 %v37_v4, %v36_v2  ;;  %469 = vmatprep.mubr.msk.f32.mxu0 %vm45_vm0, %v14_v5  ;;  %484 = vmatprep.mubr.msk.f32.mxu1 %vm45_vm0, %v24_v6  ;;  %v15_v8 = vld [vmem:[%s729_s0 + $0x8] sm:$0xff]  ;;  %v25_v9 = vld [vmem:[%s729_s0 + $0x58] sm:$0xff]  ;;  %v16_v10 = vld [vmem:[%s729_s0 + $0x10] sm:$0xff] }
   0x4   :  { %500 = vmatprep.subr.bf16.mxu0 %v499_v3  ;;  %507 = vmatprep.subr.bf16.mxu1 %v499_v3  ;;  %v26_v11 = vld [vmem:[%s729_s0 + $0x60] sm:$0xff]  ;;  %v17_v12 = vld [vmem:[%s729_s0 + $0x18] sm:$0xff]  ;;  %v27_v13 = vld [vmem:[%s729_s0 + $0x68] sm:$0xff] }
   0x5   :  { %502 = vmatpush3.bf16.msra.mxu0 %v499_v3  ;;  %509 = vmatpush3.bf16.msra.mxu1 %v499_v3  ;;  %v18_v14 = vld [vmem:[%s729_s0 + $0x20] sm:$0xff]  ;;  %v28_v15 = vld [vmem:[%s729_s0 + $0x70] sm:$0xff]  ;;  %v19_v16 = vld [vmem:[%s729_s0 + $0x28] sm:$0xff] }
   0x6   :  { %504 = vmatprep.subr.bf16.mxu0 %v503_v7  ;;  %508 = vmatprep.subr.bf16.mxu1 %v503_v7  ;;  %v29_v17 = vld [vmem:[%s729_s0 + $0x78] sm:$0xff]  ;;  %v20_v18 = vld [vmem:[%s729_s0 + $0x30] sm:$0xff]  ;;  %v30_v19 = vld [vmem:[%s729_s0 + $0x80] sm:$0xff] }
   0x7   :  { %v21_v20 = vld [vmem:[%s729_s0 + $0x38] sm:$0xff]  ;;  %v31_v21 = vld [vmem:[%s729_s0 + $0x88] sm:$0xff]  ;;  %v22_v22 = vld [vmem:[%s729_s0 + $0x40] sm:$0xff] }
   0x8   :  { %v32_v23 = vld [vmem:[%s729_s0 + $0x90] sm:$0xff]  ;;  %v23_v24 = vld [vmem:[%s729_s0 + $0x48] sm:$0xff]  ;;  %v33_v25 = vld [vmem:[%s729_s0 + $0x98] sm:$0xff] }
   0x9   :  { %506 = vmatpush3.bf16.msra.mxu0 %v503_v7  ;;  %510 = vmatpush3.bf16.msra.mxu1 %v503_v7  ;;  %v626_v26 = vld [vmem:[%s730_s2] ss:$0 sm:$0xff] }
   0xc   :  { %470 = vmatmul.mubr.msk.f32.vlgmr.msra.gmra.mrb[0].mxu0 %vm45_vm0, %v15_v8  ;;  %485 = vmatmul.mubr.msk.f32.vlgmr.msra.gmra.mrb[0].mxu1 %vm45_vm0, %v25_v9 }
   0xd   :  { %472 = vmatprep.mubr.msk.f32.mxu0 %vm45_vm0, %v16_v10  ;;  %487 = vmatprep.mubr.msk.f32.mxu1 %vm45_vm0, %v26_v11 }
  0x10   :  { %473 = vmatmul.mubr.msk.f32.gmra.mrb[2].mxu0 %vm45_vm0, %v17_v12  ;;  %488 = vmatmul.mubr.msk.f32.gmra.mrb[2].mxu1 %vm45_vm0, %v27_v13 }
  0x11   :  { %475 = vmatprep.mubr.msk.f32.mxu0 %vm45_vm0, %v18_v14  ;;  %490 = vmatprep.mubr.msk.f32.mxu1 %vm45_vm0, %v28_v15 }
  0x14   :  { %476 = vmatmul.mubr.msk.f32.gmra.mrb[4].mxu0 %vm45_vm0, %v19_v16  ;;  %491 = vmatmul.mubr.msk.f32.gmra.mrb[4].mxu1 %vm45_vm0, %v29_v17 }
  0x15   :  { %478 = vmatprep.mubr.msk.f32.mxu0 %vm45_vm0, %v20_v18  ;;  %493 = vmatprep.mubr.msk.f32.mxu1 %vm45_vm0, %v30_v19 }
  0x18   :  { %479 = vmatmul.mubr.msk.f32.gmra.mrb[6].mxu0 %vm45_vm0, %v21_v20  ;;  %494 = vmatmul.mubr.msk.f32.gmra.mrb[6].mxu1 %vm45_vm0, %v31_v21 }
  0x19   :  { %481 = vmatprep.mubr.msk.f32.mxu0 %vm45_vm0, %v22_v22  ;;  %496 = vmatprep.mubr.msk.f32.mxu1 %vm45_vm0, %v32_v23 }
  0x1c   :  { %482 = vmatmul.mubr.msk.f32.gmra.mrb[8].mxu0 %vm45_vm0, %v23_v24  ;;  %497 = vmatmul.mubr.msk.f32.gmra.mrb[8].mxu1 %vm45_vm0, %v33_v25 }
  0xdf   :  { %v471_v27 = vpop.f32.mrb[0].mxu0  ;;  %v486_v28 = vpop.f32.mrb[0].mxu1 }
  0xe0   :  { %v178_v29 = vadd.f32 %v471_v27, %v626_v26  ;;  %v228_v30 = vadd.f32 %v486_v28, %v626_v26  ;;  %v172_v31 = vpop.f32.mrb[1].mxu0  ;;  %v222_v32 = vpop.f32.mrb[1].mxu1 }
  0xe1   :  { %v173_v33 = vadd.f32 %v626_v26, %v172_v31  ;;  %v223_v34 = vadd.f32 %v626_v26, %v222_v32 }
  0xe2   :  { %v418_v35 = vpack.c.bf16 %v178_v29, %v178_v29  ;;  %v428_v36 = vpack.c.bf16 %v228_v30, %v228_v30 }
  0xe3   :  { %v417_v37 = vpack.c.bf16 %v173_v33, %v173_v33  ;;  %v427_v38 = vpack.c.bf16 %v223_v34, %v223_v34  ;;  %v474_v39 = vpop.f32.mrb[2].mxu0  ;;  %v489_v40 = vpop.f32.mrb[2].mxu1 }
  0xe4   :  { %353 = vst.msk [vmem:[%s731_s3 + $0x4] sm:$0xf] %vm351_vm1, %v418_v35  ;;  %363 = vst.msk [vmem:[%s731_s3 + $0x2c] sm:$0xf] %vm351_vm1, %v428_v36  ;;  %v188_v41 = vadd.f32 %v474_v39, %v626_v26  ;;  %v238_v42 = vadd.f32 %v489_v40, %v626_v26  ;;  %v182_v43 = vpop.f32.mrb[3].mxu0  ;;  %v232_v44 = vpop.f32.mrb[3].mxu1 }
  0xe5   :  { %352 = vst.msk [vmem:[%s731_s3] sm:$0xf] %vm351_vm1, %v417_v37  ;;  %362 = vst.msk [vmem:[%s731_s3 + $0x28] sm:$0xf] %vm351_vm1, %v427_v38  ;;  %v183_v45 = vadd.f32 %v626_v26, %v182_v43  ;;  %v233_v46 = vadd.f32 %v626_v26, %v232_v44 }
  0xe6   :  { %v420_v47 = vpack.c.bf16 %v188_v41, %v188_v41  ;;  %v430_v48 = vpack.c.bf16 %v238_v42, %v238_v42 }
  0xe7   :  { %v419_v49 = vpack.c.bf16 %v183_v45, %v183_v45  ;;  %v429_v50 = vpack.c.bf16 %v233_v46, %v233_v46  ;;  %v477_v51 = vpop.f32.mrb[4].mxu0  ;;  %v492_v52 = vpop.f32.mrb[4].mxu1 }
  0xe8   :  { %355 = vst.msk [vmem:[%s731_s3 + $0xc] sm:$0xf] %vm351_vm1, %v420_v47  ;;  %365 = vst.msk [vmem:[%s731_s3 + $0x34] sm:$0xf] %vm351_vm1, %v430_v48  ;;  %v198_v53 = vadd.f32 %v477_v51, %v626_v26  ;;  %v248_v54 = vadd.f32 %v492_v52, %v626_v26  ;;  %v192_v55 = vpop.f32.mrb[5].mxu0  ;;  %v242_v56 = vpop.f32.mrb[5].mxu1 }
  0xe9   :  { %354 = vst.msk [vmem:[%s731_s3 + $0x8] sm:$0xf] %vm351_vm1, %v419_v49  ;;  %364 = vst.msk [vmem:[%s731_s3 + $0x30] sm:$0xf] %vm351_vm1, %v429_v50  ;;  %v193_v57 = vadd.f32 %v626_v26, %v192_v55  ;;  %v243_v58 = vadd.f32 %v626_v26, %v242_v56 }
  0xea   :  { %v422_v59 = vpack.c.bf16 %v198_v53, %v198_v53  ;;  %v432_v60 = vpack.c.bf16 %v248_v54, %v248_v54 }
  0xeb   :  { %v421_v61 = vpack.c.bf16 %v193_v57, %v193_v57  ;;  %v431_v62 = vpack.c.bf16 %v243_v58, %v243_v58  ;;  %v480_v63 = vpop.f32.mrb[6].mxu0  ;;  %v495_v0 = vpop.f32.mrb[6].mxu1 }
  0xec   :  { %357 = vst.msk [vmem:[%s731_s3 + $0x14] sm:$0xf] %vm351_vm1, %v422_v59  ;;  %367 = vst.msk [vmem:[%s731_s3 + $0x3c] sm:$0xf] %vm351_vm1, %v432_v60  ;;  %v208_v1 = vadd.f32 %v480_v63, %v626_v26  ;;  %v258_v2 = vadd.f32 %v495_v0, %v626_v26  ;;  %v202_v3 = vpop.f32.mrb[7].mxu0  ;;  %v252_v4 = vpop.f32.mrb[7].mxu1 }
  0xed   :  { %356 = vst.msk [vmem:[%s731_s3 + $0x10] sm:$0xf] %vm351_vm1, %v421_v61  ;;  %366 = vst.msk [vmem:[%s731_s3 + $0x38] sm:$0xf] %vm351_vm1, %v431_v62  ;;  %v203_v5 = vadd.f32 %v626_v26, %v202_v3  ;;  %v253_v6 = vadd.f32 %v626_v26, %v252_v4 }
  0xee   :  { %v424_v7 = vpack.c.bf16 %v208_v1, %v208_v1  ;;  %v434_v8 = vpack.c.bf16 %v258_v2, %v258_v2 }
  0xef   :  { %v423_v9 = vpack.c.bf16 %v203_v5, %v203_v5  ;;  %v433_v10 = vpack.c.bf16 %v253_v6, %v253_v6  ;;  %v483_v11 = vpop.f32.mrb[8].mxu0  ;;  %v498_v12 = vpop.f32.mrb[8].mxu1 }
  0xf0   :  { %359 = vst.msk [vmem:[%s731_s3 + $0x1c] sm:$0xf] %vm351_vm1, %v424_v7  ;;  %369 = vst.msk [vmem:[%s731_s3 + $0x44] sm:$0xf] %vm351_vm1, %v434_v8  ;;  %v218_v13 = vadd.f32 %v483_v11, %v626_v26  ;;  %v268_v14 = vadd.f32 %v498_v12, %v626_v26  ;;  %v212_v15 = vpop.f32.mrb[9].mxu0  ;;  %v262_v16 = vpop.f32.mrb[9].mxu1 }
  0xf1   :  { %358 = vst.msk [vmem:[%s731_s3 + $0x18] sm:$0xf] %vm351_vm1, %v423_v9  ;;  %368 = vst.msk [vmem:[%s731_s3 + $0x40] sm:$0xf] %vm351_vm1, %v433_v10  ;;  %v213_v17 = vadd.f32 %v626_v26, %v212_v15  ;;  %v263_v18 = vadd.f32 %v626_v26, %v262_v16 }
  0xf2   :  { %v426_v19 = vpack.c.bf16 %v218_v13, %v218_v13  ;;  %v436_v20 = vpack.c.bf16 %v268_v14, %v268_v14 }
  0xf3   :  { %v425_v21 = vpack.c.bf16 %v213_v17, %v213_v17  ;;  %v435_v22 = vpack.c.bf16 %v263_v18, %v263_v18 }
  0xf4   :  { %361 = vst.msk [vmem:[%s731_s3 + $0x24] sm:$0xf] %vm351_vm1, %v426_v19  ;;  %371 = vst.msk [vmem:[%s731_s3 + $0x4c] sm:$0xf] %vm351_vm1, %v436_v20 }
  0xf5   :  { %360 = vst.msk [vmem:[%s731_s3 + $0x20] sm:$0xf] %vm351_vm1, %v425_v21  ;;  %370 = vst.msk [vmem:[%s731_s3 + $0x48] sm:$0xf] %vm351_vm1, %v435_v22 }

</bundles_post_ra>
